<compile_context>
chip_gen: v7x
topology: tpu7x:2x2x1
jax: 0.10.0
libtpu: 0.0.40
codegen_flags: <defaults>
</compile_context>

<pallas_src>
import jax
import jax.numpy as jnp
from jax import lax
from jax.experimental import pallas as pl
from jax.experimental.pallas import tpu as pltpu


def _round_up(x, m):
    return ((x + m - 1) // m) * m


def _general_scorer_kernel(dec_ref, enc_ref, wt_ref, out_ref, proj_ref):
    # dec_ref : (1, tT, Dp)   decoder tile for (batch b, T-tile t)
    # enc_ref : (1, tS, Dp)   encoder tile for (batch b, S-tile s)
    # wt_ref  : (Dp, Dp)      W_a^T (pre-transposed in the wrapper)
    # out_ref : (1, tT, tS)   score tile
    # proj_ref: (tT, Dp)      VMEM scratch: dec_tile @ W_a^T, cached over s
    s = pl.program_id(2)

    @pl.when(s == 0)
    def _():
        # Linear projection of the decoder tile, hoisted out of the S loop:
        # recomputed only when the (batch, T-tile) pair changes.
        proj = jnp.dot(dec_ref[0], wt_ref[...],
                       preferred_element_type=jnp.float32)
        proj_ref[...] = proj.astype(proj_ref.dtype)

    # score[t, s] = sum_d proj[t, d] * enc[s, d]
    # Contract the last dim of both operands directly -> feeds the MXU with no
    # in-kernel transpose of the encoder tile.
    score = lax.dot_general(
        proj_ref[...], enc_ref[0],
        dimension_numbers=(((1,), (1,)), ((), ())),
        preferred_element_type=jnp.float32)
    out_ref[0] = score.astype(out_ref.dtype)


def general_scorer(dec_out, enc_outs, W_a, *,
                   block_t=256, block_s=256,
                   compute_dtype=jnp.bfloat16):
    """GeneralScorer forward.

    dec_out: (T, B, D), enc_outs: (S, B, D), W_a: (D, D) nn.Linear weight.
    returns: (T, B, S)
    """
    T, B, D = dec_out.shape
    S, Be, De = enc_outs.shape
    assert Be == B and De == D and W_a.shape == (D, D)
    out_dtype = dec_out.dtype

    # bf16 operands for the MXU; accumulation is f32 inside the kernel.
    if compute_dtype is not None:
        dec_out = dec_out.astype(compute_dtype)
        enc_outs = enc_outs.astype(compute_dtype)
        W_a = W_a.astype(compute_dtype)

    # Lane/sublane-friendly tile sizes (multiples of 128/8; capped by the
    # padded problem size so tiny problems stay a single tile).
    d_pad = _round_up(D, 128)
    t_blk = min(block_t, _round_up(T, 8))
    s_blk = min(block_s, _round_up(S, 128))
    t_pad = _round_up(T, t_blk)
    s_pad = _round_up(S, s_blk)

    # One-time layout plumbing (in bf16 -> half the HBM traffic):
    # batch-major + zero padding of D / T / S.
    dec_bm = jnp.pad(jnp.transpose(dec_out, (1, 0, 2)),
                     ((0, 0), (0, t_pad - T), (0, d_pad - D)))    # (B, Tp, Dp)
    enc_bm = jnp.pad(jnp.transpose(enc_outs, (1, 0, 2)),
                     ((0, 0), (0, s_pad - S), (0, d_pad - D)))    # (B, Sp, Dp)
    # Pre-transpose the Linear weight once so the kernel never transposes.
    w_t = jnp.pad(W_a.T, ((0, d_pad - D), (0, d_pad - D)))        # (Dp, Dp)

    grid = (B, t_pad // t_blk, s_pad // s_blk)

    out_bm = pl.pallas_call(
        _general_scorer_kernel,
        out_shape=jax.ShapeDtypeStruct((B, t_pad, s_pad), out_dtype),
        grid_spec=pltpu.PrefetchScalarGridSpec(
            num_scalar_prefetch=0,
            grid=grid,
            in_specs=[
                pl.BlockSpec((1, t_blk, d_pad), lambda b, t, s: (b, t, 0)),
                pl.BlockSpec((1, s_blk, d_pad), lambda b, t, s: (b, s, 0)),
                # Constant block index: fetched once, never re-DMA'd.
                pl.BlockSpec((d_pad, d_pad), lambda b, t, s: (0, 0)),
            ],
            out_specs=pl.BlockSpec((1, t_blk, s_blk),
                                   lambda b, t, s: (b, t, s)),
            scratch_shapes=[pltpu.VMEM((t_blk, d_pad), dec_bm.dtype)],
        ),
        compiler_params=pltpu.CompilerParams(
            dimension_semantics=("parallel", "parallel", "arbitrary"),
            vmem_limit_bytes=64 * 1024 * 1024,
        ),
    )(dec_bm, enc_bm, w_t)

    # Strip padding and return in the PyTorch (T, B, S) layout.
    return jnp.transpose(out_bm[:, :T, :S], (1, 0, 2))


def _reference(dec_out, enc_outs, W_a, compute_dtype=jnp.bfloat16):
    # Pure-JAX reimplementation of the PyTorch forward using the same
    # precision policy as the kernel (bf16 operands, f32 accumulation).
    dec = dec_out.astype(compute_dtype)
    enc = enc_outs.astype(compute_dtype)
    w_a = W_a.astype(compute_dtype)
    proj = jnp.einsum("tbd,od->tbo", dec, w_a,
                      preferred_element_type=jnp.float32).astype(compute_dtype)
    score = jnp.einsum("tbd,sbd->tbs", proj, enc,
                       preferred_element_type=jnp.float32)
    return score.astype(dec_out.dtype)


if __name__ == "__main__":
    key = jax.random.PRNGKey(0)
    k1, k2, k3 = jax.random.split(key, 3)

    trg_len, src_len, batch, dim = 8, 8, 2, 32

    # Deterministic parameter init (stand-in for initialization.init_linear,
    # which is not part of the forward pass).
    bound = 1.0 / (dim ** 0.5)
    W_a = jax.random.uniform(k3, (dim, dim), jnp.float32, -bound, bound)

    dec_out = jax.random.normal(k1, (trg_len, batch, dim), jnp.float32)
    enc_outs = jax.random.normal(k2, (src_len, batch, dim), jnp.float32)

    out = general_scorer(dec_out, enc_outs, W_a)
    out = jax.block_until_ready(out)

    ref = _reference(dec_out, enc_outs, W_a)
    assert out.shape == (trg_len, batch, src_len)
    assert jnp.allclose(out, ref, atol=2e-2, rtol=2e-2), \
        float(jnp.max(jnp.abs(out - ref)))

    print("KERNEL_OK")
</pallas_src>

<mosaic_0001>
module attributes {stable_mosaic.version = 11 : i64} {
  func.func @_general_scorer_kernel(%arg0: i32, %arg1: i32, %arg2: i32, %arg3: memref<1x8x128xbf16, #tpu.memory_space<vmem>>, %arg4: memref<1x128x128xbf16, #tpu.memory_space<vmem>>, %arg5: memref<128x128xbf16, #tpu.memory_space<vmem>>, %arg6: memref<1x8x128xf32, #tpu.memory_space<vmem>>, %arg7: memref<8x128xbf16, #tpu.memory_space<vmem>>) attributes {dimension_semantics = [#tpu.dimension_semantics<parallel>, #tpu.dimension_semantics<parallel>, #tpu.dimension_semantics<arbitrary>], iteration_bounds = array<i64: 2, 1, 1>, scalar_prefetch = 0 : i64, scratch_operands = 1 : i64, tpu.core_type = #tpu.core_type<tc>, window_params = [{transform_indices = @transform_0, window_bounds = array<i64: 1, 8, 128>}, {transform_indices = @transform_1, window_bounds = array<i64: 1, 128, 128>}, {pipeline_mode = #tpu.pipeline_mode<synchronous>, transform_indices = @transform_2, window_bounds = array<i64: 128, 128>}, {transform_indices = @transform_3, window_bounds = array<i64: 1, 8, 128>}]} {
    %c0_i32 = arith.constant 0 : i32
    %0 = arith.cmpi eq, %arg2, %c0_i32 : i32
    %1 = arith.extui %0 : i1 to i32
    %c0_i32_0 = arith.constant 0 : i32
    %2 = arith.cmpi ne, %1, %c0_i32_0 : i32
    scf.if %2 {
      %c0_8 = arith.constant 0 : index
      %c0_9 = arith.constant 0 : index
      %c0_10 = arith.constant 0 : index
      %10 = vector.load %arg3[%c0_8, %c0_9, %c0_10] : memref<1x8x128xbf16, #tpu.memory_space<vmem>>, vector<1x8x128xbf16>
      %11 = vector.shape_cast %10 : vector<1x8x128xbf16> to vector<8x128xbf16>
      %c0_11 = arith.constant 0 : index
      %c0_12 = arith.constant 0 : index
      %12 = vector.load %arg5[%c0_11, %c0_12] : memref<128x128xbf16, #tpu.memory_space<vmem>>, vector<128x128xbf16>
      %cst_13 = arith.constant dense<0.000000e+00> : vector<8x128xf32>
      %13 = tpu.matmul %11, %12, %cst_13 {dimension_numbers = #tpu.dot_dimension_numbers<[1], [0], [0], [1], [0, 0, 1, 1], [], []>} : vector<8x128xbf16>, vector<128x128xbf16>, vector<8x128xf32> -> vector<8x128xf32>
      %14 = arith.truncf %13 : vector<8x128xf32> to vector<8x128xbf16>
      %c0_14 = arith.constant 0 : index
      %c0_15 = arith.constant 0 : index
      %15 = vector.load %arg7[%c0_14, %c0_15] : memref<8x128xbf16, #tpu.memory_space<vmem>>, vector<8x128xbf16>
      tpu.vector_store %arg7[%c0_14, %c0_15], %14 {strides = array<i32>} : memref<8x128xbf16, #tpu.memory_space<vmem>>, vector<8x128xbf16>,
    } else {
    }
    %c0 = arith.constant 0 : index
    %c0_1 = arith.constant 0 : index
    %3 = vector.load %arg7[%c0, %c0_1] : memref<8x128xbf16, #tpu.memory_space<vmem>>, vector<8x128xbf16>
    %c0_2 = arith.constant 0 : index
    %c0_3 = arith.constant 0 : index
    %c0_4 = arith.constant 0 : index
    %4 = vector.load %arg4[%c0_2, %c0_3, %c0_4] : memref<1x128x128xbf16, #tpu.memory_space<vmem>>, vector<1x128x128xbf16>
    %5 = vector.shape_cast %4 : vector<1x128x128xbf16> to vector<128x128xbf16>
    %cst = arith.constant dense<0.000000e+00> : vector<8x128xf32>
    %6 = tpu.matmul %3, %5, %cst {dimension_numbers = #tpu.dot_dimension_numbers<[1], [1], [0], [0], [0, 0, 1, 0], [], []>} : vector<8x128xbf16>, vector<128x128xbf16>, vector<8x128xf32> -> vector<8x128xf32>
    %c0_5 = arith.constant 0 : index
    %c0_6 = arith.constant 0 : index
    %c0_7 = arith.constant 0 : index
    %7 = vector.load %arg6[%c0_5, %c0_6, %c0_7] : memref<1x8x128xf32, #tpu.memory_space<vmem>>, vector<1x8x128xf32>
    %8 = vector.shape_cast %7 : vector<1x8x128xf32> to vector<8x128xf32>
    %9 = vector.shape_cast %6 : vector<8x128xf32> to vector<1x8x128xf32>
    tpu.vector_store %arg6[%c0_5, %c0_6, %c0_7], %9 {strides = array<i32>} : memref<1x8x128xf32, #tpu.memory_space<vmem>>, vector<1x8x128xf32>,
    return
  }
  func.func @transform_0(%arg0: i32, %arg1: i32, %arg2: i32) -> (i32, i32, i32) {
    %c0_i32 = arith.constant 0 : i32
    %c0_i32_0 = arith.constant 0 : i32
    return %arg0, %arg1, %c0_i32 : i32, i32, i32
  }
  func.func @transform_1(%arg0: i32, %arg1: i32, %arg2: i32) -> (i32, i32, i32) {
    %c0_i32 = arith.constant 0 : i32
    %c0_i32_0 = arith.constant 0 : i32
    return %arg0, %arg2, %c0_i32 : i32, i32, i32
  }
  func.func @transform_2(%arg0: i32, %arg1: i32, %arg2: i32) -> (i32, i32) {
    %c0_i32 = arith.constant 0 : i32
    %c0_i32_0 = arith.constant 0 : i32
    %c0_i32_1 = arith.constant 0 : i32
    return %c0_i32, %c0_i32_0 : i32, i32
  }
  func.func @transform_3(%arg0: i32, %arg1: i32, %arg2: i32) -> (i32, i32, i32) {
    %c0_i32 = arith.constant 0 : i32
    return %arg0, %arg1, %arg2 : i32, i32, i32
  }
}

</mosaic_0001>

<bundles_post_ra>
// kernel: tpu_custom_call.1
= control target key start
LH: loop header
LB: loop body
LE: loop exit
PB: predicated region body
PF: predicated region fallthrough
CT: control target
= control target key end

     0   :  { %s1304_s0 = inlined_call_operand.hbm [shape: bf16[2,8,128], index: 0, kind: input, shape index: {}]   ;;  %s1305_s1 = inlined_call_operand.hbm [shape: bf16[2,128,128], index: 1, kind: input, shape index: {}]   ;;  %s1306_s2 = inlined_call_operand.hbm [shape: bf16[128,128], index: 2, kind: input, shape index: {}]   ;;  %s1307_s3 = inlined_call_operand.hbm [shape: f32[2,8,128], index: 3, kind: output, shape index: {}]  }
   0x1   :  { %1313 = sst [smem:[#allocation14_spill]] %s1304_s0 }
   0x2   :  { %8 = vsyncpa [#allocation4], 0 }
   0x3   :  { %10 = vsyncpa [#allocation4 + $0x1], 0 }
   0x4   :  { %11 = vsyncpa [#allocation7], 0 }
   0x5   :  { %13 = vsyncpa [#allocation7 + $0x1], 0 }
   0x6   :  { %14 = vsyncpa [#allocation5], 0 }
   0x7   :  { %16 = vsyncpa [#allocation5 + $0x1], 0  ;;  %s1024_s12 = smov 0   ;;  %s1026_s13 = smov 0  }
   0x8   :  { %s1028_s14 = smov 0   ;;  %s1030_s15 = smov 0  }
   0x9   :  { %s1032_s16 = smov 0   ;;  %s1034_s17 = smov 0  }
   0xa LB: > { %s1055_s18 = sadd.s32 4294967295, %s994_s17   ;;  %s625_s19 = sadd.s32 4294967294, %s994_s17   ;;  %s994_s17 = sphi %s1034_s17, %s22_s17   ;;  %s990_s16 = sphi %s1032_s16, %s1335_s16   ;;  %s986_s15 = sphi %s1030_s15, %s1334_s15   ;;  %s982_s14 = sphi %s1028_s14, %s1333_s14   ;;  %s978_s13 = sphi %s1026_s13, %s1332_s13   ;;  %s974_s12 = sphi %s1024_s12, %s1331_s12  }
   0xb   : > { %p63_p0 = scmp.ne.s32.totalorder %s978_s13, %s974_s12  ;;  %p1308_p1 = scmp.eq.s32.totalorder %s1055_s18, 0 }
   0xc   : > { %p146_p3 = scmp.eq.s32.totalorder %s625_s19, 1  ;;  %p626_p5 = scmp.ge.s32.totalorder %s994_s17, 1 }
   0xd   : > { %p1064_p4 = por %p1308_p1, %p63_p0  ;;  %p153_p7 = scmp.lt.s32.totalorder %s994_s17, 3 }
   0xe   : > { %p1069_p6 = por %p146_p3, %p63_p0  ;;  %s996_s23 = smov [#allocation8]  }
   0xf   : > { %s1314_s20 = scalar_select %p1064_p4, 1, 0 }
  0x10   : > { %s1315_s21 = scalar_select %p1069_p6, 1, 0 }
  0x11   : > { %p1074_p8 = pnand %p626_p5, %p153_p7  ;;  %s165_s24 = sshll.u32 %s996_s23, 4  ;;  %s166_s24 = int_to_ptr.vmem [resolvable:$true] %s165_s24 }
  0x12   : > { %s41_s26 = sadd.s32 1, %s990_s16  ;;  %s816_s29 = scalar_lea.hbm %s1306_s2, 1024 }
  0x13   : > { %s1316_s22 = scalar_select %p1074_p8, 1, 0 }
  0x14   : > { %p728_p9 = pneg %p1074_p8  ;;  %p817_p12 = scmp.ne.s32.totalorder %s1306_s2, %s816_s29 }
  0x15   : > { %p823_p5 = scmp.lt.u32.totalorder %s816_s29, %s1306_s2 }
  0x16   : > { %p1083_p11 = pnand %p728_p9, %p1308_p1 }
  0x18   : > { %p818_p13 = pneg %p1083_p11 }
  0x1a   : > { %p819_p0 = pnand %p818_p13, %p817_p12 }
  0x1c   : > { %p820_p3 = pneg %p819_p0 }
  0x1e   : > { %p825_p7 = pnand %p823_p5, %p820_p3 }
  0x20   : > { %828 = shalt.err (!%p825_p7)
}
  0x21   : > { %s829_s7 = scalar_lea.vmem %s166_s24, 1024  ;;  %p837_p2 = scmp.lt.s32.totalorder %s166_s24, %s166_s24 }
  0x22   : > { %p830_p9 = scmp.ne.s32.totalorder %s166_s24, %s829_s7  ;;  %p838_p6 = scmp.lt.s32.totalorder %s829_s7, %s829_s7 }
  0x24   : > { %p832_p10 = pnand %p830_p9, %p818_p13  ;;  %p839_p4 = por %p838_p6, %p837_p2 }
  0x26   : > { %p833_p1 = pneg %p832_p10 }
  0x28   : > { %p840_p8 = pnand %p839_p4, %p833_p1 }
  0x2a   : > { %843 = shalt.err (!%p840_p8)
}
  0x2b   : > { %s1311_s8 = smov 64   ;;  %s1312_s9 = smov 4  }
  0x2c   : > { %731 = dma.hbm_to_vmem [thread:$0]  (!%p1083_p11), %s1306_s2, 1024, %s166_s24, [#allocation7], %s1311_s8, %s1311_s8, %s1312_s9  }
  0x2d   : > { %p43_p1 = scmp.ge.s32.totalorder %s41_s26, 2  ;;  %s50_s19 = sadd.s32 1, %s982_s14 }
  0x2e   : > { %p57_p2 = scmp.ne.s32.totalorder %s982_s14, %s978_s13  ;;  %p58_p4 = scmp.eq.s32.totalorder %s994_s17, 0 }
  0x2f   : > { %s1337_s26 = smov (%p43_p1, %s41_s26), 0  ;;  %p1319_p8 = scmp.eq.s32.totalorder %s1055_s18, 1 }
  0x30   : > { %p1113_p6 = por %p58_p4, %p57_p2  ;;  %s45_s27 = ssub.s32 %s990_s16, %s1337_s26 }
  0x31   : > { %p1119_p10 = por %p1319_p8, %p57_p2  ;;  %p744_p11 = scmp.lt.s32.totalorder %s994_s17, 2 }
  0x32   : > { %p48_p12 = scmp.eq.s32.totalorder %s45_s27, 0  ;;  %s1127_s24 = sand.u32 1, %s982_s14  }
  0x33   : > { %s629_s28 = sshll.u32 %s1127_s24, 2  ;;  %s630_s30 = sshll.u32 %s990_s16, 6 }
  0x34   : > { %s1131_s29 = scalar_select %p48_p12, %s982_s14, %s50_s19  }
  0x35   : > { %s1321_s0 = sld [smem:[#allocation14_spill]]  ;;  %s183_s7 = scalar_lea.vmem [#allocation3], %s629_s28 }
  0x36   : > { %s191_s10 = sshll.u32 %s183_s7, 4  ;;  %p1143_p13 = pnand %p744_p11, %p1113_p6  ;;  %s1139_s10 = int_to_ptr.vmem [resolvable:$true] %s191_s10 }
  0x37   : > { %s631_s19 = sshll.u32 %s1127_s24, 6  ;;  %s659_s27 = sshll.u32 %s990_s16, 10 }
  0x38   : > { %s180_s4 = scalar_lea.sflag [#allocation4], %s1127_s24  ;;  %p846_p3 = pneg %p1143_p13 }
  0x3b   : > { %s1137_s6 = scalar_lea.hbm %s1321_s0, %s630_s30  ;;  %s849_s23 = scalar_lea.hbm %s1321_s0, 128 }
  0x3c   : > { %s844_s30 = scalar_lea.hbm %s1137_s6, 64  ;;  %p850_p9 = scmp.lt.u32.totalorder %s1137_s6, %s1321_s0 }
  0x3d   : > { %p845_p0 = scmp.ne.s32.totalorder %s1137_s6, %s844_s30  ;;  %p851_p1 = scmp.lt.u32.totalorder %s849_s23, %s844_s30 }
  0x3e   : > { %p853_p4 = scmp.lt.u32.totalorder %s844_s30, %s1137_s6 }
  0x3f   : > { %p847_p5 = pnand %p846_p3, %p845_p0  ;;  %p852_p2 = por %p851_p1, %p850_p9 }
  0x41   : > { %p848_p7 = pneg %p847_p5  ;;  %p854_p6 = por %p853_p4, %p852_p2 }
  0x43   : > { %p855_p8 = pnand %p854_p6, %p848_p7 }
  0x45   : > { %858 = shalt.err (!%p855_p8)
}
  0x46   : > { %s859_s9 = scalar_lea.vmem %s1139_s10, 64  ;;  %s999_s28 = smov [#allocation3]  }
  0x47   : > { %p860_p11 = scmp.ne.s32.totalorder %s1139_s10, %s859_s9  ;;  %s864_s5 = sshll.u32 %s999_s28, 4  ;;  %s865_s5 = int_to_ptr.vmem [resolvable:$false] %s864_s5 }
  0x48   : > { %s866_s8 = scalar_lea.vmem %s865_s5, 128  ;;  %p867_p5 = scmp.lt.s32.totalorder %s1139_s10, %s865_s5 }
  0x49   : > { %p862_p12 = pnand %p860_p11, %p846_p3  ;;  %p868_p9 = scmp.lt.s32.totalorder %s866_s8, %s859_s9 }
  0x4b   : > { %p863_p0 = pneg %p862_p12  ;;  %p869_p1 = por %p868_p9, %p867_p5 }
  0x4d   : > { %p870_p2 = pnand %p869_p1, %p863_p0 }
  0x4f   : > { %873 = shalt.err (!%p870_p2)
}
  0x50   : > { %735 = dma.hbm_to_vmem [thread:$0]  (!%p1143_p13), %s1137_s6, 64, %s1139_s10, %s180_s4  }
  0x51   : > { %s202_s30 = scalar_lea.vmem [#allocation6], %s631_s19  ;;  %s198_s7 = sand.u32 1, %s994_s17  }
  0x52   : > { %s211_s23 = sshll.u32 %s202_s30, 4  ;;  %s1185_s5 = scalar_lea.hbm %s1305_s1, %s659_s27  ;;  %s1178_s23 = int_to_ptr.vmem [resolvable:$true] %s211_s23 }
  0x53   : > { %s1187_s8 = scalar_lea.sflag [#allocation7], %s198_s7  ;;  %s874_s0 = scalar_lea.hbm %s1185_s5, 1024 }
  0x54   : > { %p875_p7 = scmp.ne.s32.totalorder %s1185_s5, %s874_s0  ;;  %s879_s10 = scalar_lea.hbm %s1305_s1, 2048 }
  0x55   : > { %p880_p8 = scmp.lt.u32.totalorder %s1185_s5, %s1305_s1  ;;  %p881_p11 = scmp.lt.u32.totalorder %s879_s10, %s874_s0 }
  0x56   : > { %p877_p4 = pnand %p875_p7, %p846_p3  ;;  %p883_p0 = scmp.lt.u32.totalorder %s874_s0, %s1185_s5 }
  0x57   : > { %p882_p12 = por %p881_p11, %p880_p8 }
  0x58   : > { %p878_p6 = pneg %p877_p4 }
  0x59   : > { %p884_p5 = por %p883_p0, %p882_p12 }
  0x5b   : > { %p885_p9 = pnand %p884_p5, %p878_p6 }
  0x5d   : > { %888 = shalt.err (!%p885_p9)
}
  0x5e   : > { %s889_s27 = scalar_lea.vmem %s1178_s23, 1024  ;;  %s1000_s30 = smov [#allocation6]  }
  0x5f   : > { %p890_p1 = scmp.ne.s32.totalorder %s1178_s23, %s889_s27  ;;  %s894_s7 = sshll.u32 %s1000_s30, 4  ;;  %s895_s7 = int_to_ptr.vmem [resolvable:$false] %s894_s7 }
  0x60   : > { %s896_s9 = scalar_lea.vmem %s895_s7, 2048  ;;  %p897_p4 = scmp.lt.s32.totalorder %s1178_s23, %s895_s7 }
  0x61   : > { %p892_p2 = pnand %p890_p1, %p846_p3  ;;  %p898_p8 = scmp.lt.s32.totalorder %s896_s9, %s889_s27 }
  0x63   : > { %p893_p7 = pneg %p892_p2  ;;  %p899_p11 = por %p898_p8, %p897_p4 }
  0x65   : > { %p900_p12 = pnand %p899_p11, %p893_p7 }
  0x67   : > { %903 = shalt.err (!%p900_p12)
}
  0x68   : > { %s1323_s0 = smov 4   ;;  %s1324_s28 = smov 64  }
  0x69   : > { %738 = dma.hbm_to_vmem [thread:$0]  (!%p1143_p13), %s1185_s5, 1024, %s1178_s23, %s1187_s8, %s1324_s28, %s1324_s28, %s1323_s0  }
  0x6a   : > { %p1325_p3 = scmp.ne.s32.totalorder %s1316_s22, 0 }
  0x6b   : > { %s1219_s24 = sand.u32 (!%p1325_p3), 1, %s978_s13   ;;  %p1326_p6 = scmp.ne.s32.totalorder (!%p1325_p3), %s1314_s20, 0 }
  0x6c   : > { %223 = sbr.rel (%p1325_p3) target bundleno = 605 (0x25d), region = 32  ;;  %s635_s6 = sshll.u32 (!%p1325_p3), %s1219_s24, 2 }
  0x6d   : > { %s226_s10 = scalar_lea.sflag (!%p1325_p3), [#allocation4], %s1219_s24  ;;  %s1223_s19 = scalar_lea.vmem (!%p1325_p3), [#allocation3], %s635_s6 }
  0x73   : > { %957 = dma.done.wait (%p1326_p6), %s226_s10, 64  }
  0x74   : > { %959 = vsyncadd (%p1326_p6), %s226_s10, 4294967232  ;;  %s234_s22 = sand.u32 1, %s1055_s18   ;;  %s636_s11 = sshll.u32 %s1219_s24, 6 }
  0x75   : > { %s235_s23 = scalar_lea.sflag [#allocation7], %s234_s22  ;;  %s1231_s5 = scalar_lea.vmem [#allocation6], %s636_s11 }
  0x76   : > { %961 = dma.done.wait (%p1326_p6), %s235_s23, 1024  }
  0x77   : > { %963 = vsyncadd (%p1326_p6), %s235_s23, 4294966272  ;;  %p1327_p13 = scmp.eq.s32.totalorder %s1055_s18, 0 }
  0x79   : > { %965 = dma.done.wait (%p1327_p13), [#allocation7], 1024   ;;  %p1328_p0 = pmov %p1327_p13 }
  0x7a   : > { %v1001_v0 = vmov 0.0   ;;  %vm1002_vm0 = vmmov 0   ;;  %v800_v1 = vld [vmem:[#allocation8] sm:$0xff]   ;;  %v801_v2 = vld [vmem:[#allocation8 + $0x8] sm:$0xff]   ;;  %v802_v3 = vld [vmem:[#allocation8 + $0x10] sm:$0xff]   ;;  %s638_s18 = sshll.u32 %s1219_s24, 3 }
  0x7b   : > { %967 = vsyncadd (%p1328_p0), [#allocation7], 4294966272  ;;  %678 = vmatprep.subr.bf16.mxu0 %v1001_v0  ;;  %694 = vmatprep.mubr.msk.bf16.mxu0 %vm1002_vm0, %v1001_v0  ;;  %v808_v4 = vld [vmem:[%s1231_s5] sm:$0xff]   ;;  %v803_v5 = vld [vmem:[#allocation8 + $0x18] sm:$0xff]   ;;  %s269_s20 = scalar_lea.vmem [#allocation9], %s638_s18  ;;  %s656_s4 = sshll.u32 %s986_s15, 7 }
  0x7c   : > { %698 = vmatprep.subr.bf16.mxu1 %v1001_v0  ;;  %714 = vmatprep.mubr.msk.bf16.mxu1 %vm1002_vm0, %v1001_v0  ;;  %v804_v6 = vld [vmem:[#allocation8 + $0x20] sm:$0xff]   ;;  %v809_v7 = vld [vmem:[%s1231_s5 + $0x8] sm:$0xff]   ;;  %v806_v9 = vld [vmem:[#allocation8 + $0x30] sm:$0xff]   ;;  %s505_s8 = sshll.u32 %s269_s20, 4  ;;  %s1257_s7 = scalar_lea.hbm %s1307_s3, %s656_s4  ;;  %s1252_s8 = int_to_ptr.vmem [resolvable:$true] %s505_s8 }
  0x7d   : > { %679 = vmatpush3.bf16.msra.mxu0 %v800_v1  ;;  %699 = vmatpush3.bf16.xpose.msra.mxu1 %v808_v4  ;;  %v805_v8 = vld [vmem:[#allocation8 + $0x28] sm:$0xff]   ;;  %v810_v10 = vld [vmem:[%s1231_s5 + $0x10] sm:$0xff]   ;;  %v807_v11 = vld [vmem:[#allocation8 + $0x38] sm:$0xff]   ;;  %s490_s9 = scalar_lea.sflag [#allocation5], %s1219_s24  ;;  %s904_s0 = scalar_lea.vmem %s1252_s8, 128 }
  0x7e   : > { %680 = vmatprep.subr.bf16.mxu0 %v1001_v0  ;;  %700 = vmatprep.subr.bf16.mxu1 %v1001_v0  ;;  %v276_v12 = vld [vmem:[%s1223_s19] sm:$0xf]  ;;  %v812_v14 = vld [vmem:[%s1231_s5 + $0x20] sm:$0xff]   ;;  %v813_v15 = vld [vmem:[%s1231_s5 + $0x28] sm:$0xff]   ;;  %p905_p5 = scmp.ne.s32.totalorder %s1252_s8, %s904_s0  ;;  %s1003_s15 = smov [#allocation9]  }
  0x7f   : > { %v811_v13 = vld [vmem:[%s1231_s5 + $0x18] sm:$0xff]   ;;  %v814_v16 = vld [vmem:[%s1231_s5 + $0x30] sm:$0xff]   ;;  %s908_s28 = sshll.u32 %s1003_s15, 4  ;;  %s909_s28 = int_to_ptr.vmem [resolvable:$false] %s908_s28 }
  0x80   : > { %v815_v17 = vld [vmem:[%s1231_s5 + $0x38] sm:$0xff]   ;;  %p906_p9 = pnand %p905_p5, %p1119_p10  ;;  %s910_s6 = scalar_lea.vmem %s909_s28, 256 }
  0x81   : > { %681 = vmatpush3.bf16.msra.mxu0 %v801_v2  ;;  %p911_p2 = scmp.lt.s32.totalorder %s1252_s8, %s909_s28  ;;  %p912_p7 = scmp.lt.s32.totalorder %s910_s6, %s904_s0 }
  0x82   : > { %682 = vmatprep.subr.bf16.mxu0 %v1001_v0  ;;  %p907_p1 = pneg %p906_p9 }
  0x83   : > { %p913_p4 = por %p912_p7, %p911_p2 }
  0x85   : > { %683 = vmatpush3.bf16.msra.mxu0 %v802_v3  ;;  %701 = vmatpush3.bf16.xpose.msra.mxu1 %v809_v7  ;;  %p914_p8 = pnand %p913_p4, %p907_p1 }
  0x86   : > { %684 = vmatprep.subr.bf16.mxu0 %v1001_v0  ;;  %702 = vmatprep.subr.bf16.mxu1 %v1001_v0 }
  0x89   : > { %685 = vmatpush3.bf16.msra.mxu0 %v803_v5 }
  0x8a   : > { %686 = vmatprep.subr.bf16.mxu0 %v1001_v0 }
  0x8d   : > { %687 = vmatpush3.bf16.msra.mxu0 %v804_v6  ;;  %703 = vmatpush3.bf16.xpose.msra.mxu1 %v810_v10 }
  0x8e   : > { %688 = vmatprep.subr.bf16.mxu0 %v1001_v0  ;;  %704 = vmatprep.subr.bf16.mxu1 %v1001_v0 }
  0x91   : > { %689 = vmatpush3.bf16.msra.mxu0 %v805_v8 }
  0x92   : > { %690 = vmatprep.subr.bf16.mxu0 %v1001_v0 }
  0x95   : > { %691 = vmatpush3.bf16.msra.mxu0 %v806_v9  ;;  %705 = vmatpush3.bf16.xpose.msra.mxu1 %v811_v13 }
  0x96   : > { %692 = vmatprep.subr.bf16.mxu0 %v1001_v0  ;;  %706 = vmatprep.subr.bf16.mxu1 %v1001_v0 }
  0x99   : > { %693 = vmatpush3.bf16.msra.mxu0 %v807_v11 }
  0x9c   : > { %695 = vmatmul.mubr.bf16.vlgmr.msra.gmra.mrb[0].mxu0 %v276_v12 }
  0x9d   : > { %707 = vmatpush3.bf16.xpose.msra.mxu1 %v812_v14 }
  0x9e   : > { %708 = vmatprep.subr.bf16.mxu1 %v1001_v0 }
  0xa5   : > { %709 = vmatpush3.bf16.xpose.msra.mxu1 %v813_v15 }
  0xa6   : > { %710 = vmatprep.subr.bf16.mxu1 %v1001_v0 }
  0xad   : > { %711 = vmatpush3.bf16.xpose.msra.mxu1 %v814_v16 }
  0xae   : > { %712 = vmatprep.subr.bf16.mxu1 %v1001_v0 }
  0xb5   : > { %713 = vmatpush3.bf16.xpose.msra.mxu1 %v815_v17 }
 0x16f   : > { %v375_v18 = vpop.f32.mrb[0].mxu0 }
 0x170   : > { %v381_v19 = vpack.c.bf16 %v375_v18, %v375_v18  ;;  %v696_v20 = vpop.f32.mrb[1].mxu0 }
 0x171   : > { %v378_v21 = vpop.f32.mrb[2].mxu0 }
 0x172   : > { %382 = vst [vmem:[#allocation2] sm:$0xf] %v381_v19  ;;  %v697_v22 = vpop.f32.mrb[3].mxu0 }
 0x179   : > { %v383_v23 = vld [vmem:[#allocation2] sm:$0xf] }
 0x17a   : > { %715 = vmatmul.mubr.bf16.vlgmr.msra.gmra.mrb[0].mxu1 %v383_v23 }
 0x24d   : > { %v482_v24 = vpop.f32.mrb[0].mxu1 }
 0x24e   : > { %488 = vst [vmem:[%s269_s20] sm:$0xff] %v482_v24  ;;  %v716_v25 = vpop.f32.mrb[1].mxu1 }
 0x24f   : > { %v485_v26 = vpop.f32.mrb[2].mxu1 }
 0x250   : > { %917 = shalt.err (!%p914_p8)
}
 0x251   : > { %s918_s24 = scalar_lea.hbm %s1257_s7, 128  ;;  %s922_s22 = scalar_lea.hbm %s1307_s3, 256 }
 0x252   : > { %p919_p11 = scmp.ne.s32.totalorder %s1257_s7, %s918_s24  ;;  %p923_p6 = scmp.lt.u32.totalorder %s1257_s7, %s1307_s3 }
 0x253   : > { %p924_p13 = scmp.lt.u32.totalorder %s922_s22, %s918_s24  ;;  %p926_p5 = scmp.lt.u32.totalorder %s918_s24, %s1257_s7 }
 0x254   : > { %p920_p12 = pnand %p919_p11, %p1119_p10 }
 0x255   : > { %p925_p0 = por %p924_p13, %p923_p6 }
 0x256   : > { %p921_p3 = pneg %p920_p12 }
 0x257   : > { %p927_p9 = por %p926_p5, %p925_p0 }
 0x259   : > { %p928_p1 = pnand %p927_p9, %p921_p3 }
 0x25b   : > { %931 = shalt.err (!%p928_p1)
}
 0x25c   : > { %726 = dma.vmem_to_hbm [thread:$0]  (%p1119_p10), %s1252_s8, 128, %s1257_s7, %s490_s9   ;;  %v717_v27 = vpop.f32.mrb[3].mxu1 }
 0x25d PF: > { %s517_s5 = sand.u32 1, %s974_s12   ;;  %p1329_p2 = scmp.ne.s32.totalorder %s1315_s21, 0 }
 0x25e   : > { %p1330_p7 = scmp.ge.s32.totalorder %s994_s17, 2  ;;  %s518_s18 = scalar_lea.sflag [#allocation5], %s517_s5 }
 0x260   : > { %p740_p4 = pnand %p1330_p7, %p1329_p2 }
 0x262   : > { %969 = dma.done.wait (!%p740_p4), %s518_s18, 128  }
 0x263   : > { %971 = vsyncadd (!%p740_p4), %s518_s18, 4294967168  ;;  %s22_s17 = sadd.s32 1, %s994_s17   ;;  %s1331_s12 = smov %s978_s13 }
 0x264   : > { %p19_p8 = scmp.ge.s32.totalorder %s22_s17, 4   ;;  %s1332_s13 = smov %s982_s14 }
 0x265   : > { %s1333_s14 = smov %s1131_s29  ;;  %s1334_s15 = smov %s990_s16 }
 0x266   : > { %s1335_s16 = smov %s1337_s26  ;;  %21 = sbr.rel (!%p19_p8) target bundleno = 10 (0xa), region = 98 }
 0x26d   :  { %523 = vsyncpa [#allocation4], 1 }
 0x26e   :  { %525 = vsyncpa [#allocation4 + $0x1], 1 }
 0x26f   :  { %526 = vsyncpa [#allocation7], 1 }
 0x270   :  { %528 = vsyncpa [#allocation7 + $0x1], 1 }
 0x271   :  { %529 = vsyncpa [#allocation5], 1 }
 0x272   :  { %531 = vsyncpa [#allocation5 + $0x1], 1 }

</bundles_post_ra>
